<compile_context>
chip_gen: v7x
topology: tpu7x:2x2x1
jax: 0.10.0
libtpu: 0.0.40
codegen_flags: <defaults>
</compile_context>

<pallas_src>
import functools

import jax
import jax.numpy as jnp
from jax.experimental import pallas as pl
from jax.experimental.pallas import tpu as pltpu


def _cdiv(a, b):
    return -(-a // b)


def _pow_p(x, p):
    """|x|**p with cheap VPU special cases (p is a static Python float)."""
    if p == 2.0:
        return x * x            # |x|^2 == x*x: no abs, no transcendentals
    if p == 1.0:
        return jnp.abs(x)
    if float(p).is_integer() and p > 0:
        ax = jnp.abs(x)
        r = ax
        for _ in range(int(p) - 1):
            r = r * ax
        return r
    return jnp.power(jnp.abs(x), p)   # non-integer exponent: exact EUP path


def _at_kernel(s_ref, t_ref, out_ref, am_s_ref, am_t_ref, *, p, eps):
    # Block shapes: s_ref/t_ref -> (TB, CC, HW); out_ref -> (1, 1, 128).
    # Scratch:      am_s_ref/am_t_ref -> (TB, HW) f32, persistent across the
    #               "arbitrary" channel-chunk axis (innermost grid axis).
    c = pl.program_id(1)

    @pl.when(c == 0)
    def _():
        am_s_ref[...] = jnp.zeros_like(am_s_ref)
        am_t_ref[...] = jnp.zeros_like(am_t_ref)

    s = s_ref[...].astype(jnp.float32)
    t = t_ref[...].astype(jnp.float32)
    # Attention-map partial sums over this channel chunk -> (TB, HW).
    am_s_ref[...] += jnp.sum(_pow_p(s, p), axis=1)
    am_t_ref[...] += jnp.sum(_pow_p(t, p), axis=1)

    @pl.when(c == pl.num_programs(1) - 1)
    def _():
        am_s = am_s_ref[...]
        am_t = am_t_ref[...]
        # Per-batch-element Frobenius norm over the flattened spatial axis.
        norm_s = jnp.sqrt(jnp.sum(am_s * am_s, axis=-1, keepdims=True))
        norm_t = jnp.sqrt(jnp.sum(am_t * am_t, axis=-1, keepdims=True))
        inv_s = pl.reciprocal(norm_s + eps)     # exact; replaces per-element divides
        inv_t = pl.reciprocal(norm_t + eps)
        diff = am_s * inv_s - am_t * inv_t
        partial = jnp.sum(diff * diff)
        # Lane-dense partial-sum store (unmasked vst); wrapper reads [:, 0, 0].
        out_ref[...] = jnp.full(out_ref.shape, partial, dtype=out_ref.dtype)


def _vmem_limit_bytes():
    """Generation-aware scoped-VMEM limit: 3/4 of physical, capped at 96 MiB.

    -> 96 MiB on v5e/v6e (128 MiB physical VMEM), 48 MiB on v7x (64 MiB).
    Falls back to the conservative v7x-safe value if the query is unavailable.
    """
    cap = 64 * 1024 * 1024
    try:
        info = pltpu.get_tpu_info()
        cap = int(getattr(info, "vmem_capacity_bytes", cap) or cap)
    except Exception:
        pass
    return int(min((cap * 3) // 4, 96 * 1024 * 1024))


def _choose_tiling(n, c, hw, itemsize, vmem_limit):
    """Pick (TB batch tile, CC channel chunk) for the (nb, ncb) grid.

    Per-step footprint counted against ~3/4 of vmem_limit:
      * 2 inputs x 2 pipeline buffers of (TB, CC, HW) in the input dtype,
      * ~2x (TB, CC, HW) f32 in-kernel temporaries (astype + |x|^p),
      * 2x (TB, HW) f32 accumulator scratch (padded to (8, 128) tiles).
    """
    hw_pad = _cdiv(hw, 128) * 128
    budget = (vmem_limit * 3) // 4

    def step_bytes(tb, cc):
        dma = 4 * tb * cc * hw * itemsize          # 2 inputs x double-buffered DMA
        temps = 2 * tb * cc * hw * 4               # f32 working copies
        scratch = 2 * _cdiv(tb, 8) * 8 * hw_pad * 4
        return dma + temps + scratch

    # Channel chunk: full C when a (1, C, HW) step fits; otherwise split C into
    # balanced multiples of 8 sublanes so zero padding stays minimal.
    if step_bytes(1, c) <= budget:
        cc = c
    else:
        per_chan = hw * (4 * itemsize + 2 * 4)
        avail = max(budget - 2 * 8 * hw_pad * 4, per_chan)
        cc_max = max(8, ((avail // per_chan) // 8) * 8)
        ncb = _cdiv(c, cc_max)
        cc = _cdiv(_cdiv(c, ncb), 8) * 8

    # Batch tile: as big as the budget allows, but capped so the (parallel)
    # batch axis still has >= 2 (up to 4) grid blocks for v7x's two TensorCores,
    # then rebalanced so zero padding of N is minimal.
    per_b = cc * hw * (4 * itemsize + 2 * 4) + 2 * hw_pad * 4
    tb = max(1, min(n, budget // per_b))
    min_blocks = max(1, min(n, 4))
    tb = min(tb, max(1, _cdiv(n, min_blocks)))
    nb = _cdiv(n, tb)
    tb = _cdiv(n, nb)
    return int(tb), int(cc)


def _make_in_spec(block_shape, index_map, triple_buffer):
    if triple_buffer and hasattr(pl, "Buffered"):
        try:
            return pl.BlockSpec(block_shape, index_map, pipeline_mode=pl.Buffered(3))
        except TypeError:   # older BlockSpec signature — fall back to default depth
            pass
    return pl.BlockSpec(block_shape, index_map)


def at_loss(fm_s, fm_t, p=2.0, eps=1e-6):
    """Attention-transfer loss: MSE between normalized channel-summed |fm|^p maps."""
    assert fm_s.shape == fm_t.shape
    N, C, H, W = fm_s.shape
    HW = H * W

    # Flatten spatial dims so the lane (last) axis is H*W (lane-dense vregs/DMAs).
    # TODO(synk): for tiny maps (H*W < 128) a layout folding part of C into the
    # lane axis would recover lane occupancy without inflating HBM traffic.
    s2 = fm_s.reshape(N, C, HW)
    t2 = fm_t.reshape(N, C, HW)

    itemsize = jnp.dtype(fm_s.dtype).itemsize
    vmem_limit = _vmem_limit_bytes()
    tb, cc = _choose_tiling(N, C, HW, itemsize, vmem_limit)
    nb = _cdiv(N, tb)
    ncb = _cdiv(C, cc)

    # Zero-pad batch / channel axes up to tile multiples. Padded elements are
    # exactly neutral: |0|^p = 0 adds nothing to the channel sums, an all-zero
    # attention row gives diff == 0, and the final mean divides by the real N.
    n_pad, c_pad = nb * tb, ncb * cc
    if (n_pad, c_pad) != (N, C):
        pad = ((0, n_pad - N), (0, c_pad - C), (0, 0))
        s2 = jnp.pad(s2, pad)
        t2 = jnp.pad(t2, pad)

    kernel = functools.partial(_at_kernel, p=float(p), eps=float(eps))

    # Triple-buffer the inputs only when tiles are small and the grid is long
    # enough for the extra pipeline depth to actually hide DMA latency.
    triple = (tb * cc * HW * itemsize <= 2 * 1024 * 1024) and (nb * ncb >= 4)
    in_spec = _make_in_spec((tb, cc, HW), lambda b, k: (b, k, 0), triple)

    partials = pl.pallas_call(
        kernel,
        out_shape=jax.ShapeDtypeStruct((nb, 1, 128), jnp.float32),
        grid_spec=pltpu.PrefetchScalarGridSpec(
            num_scalar_prefetch=0,
            grid=(nb, ncb),                           # reduction (C) axis innermost
            in_specs=[in_spec, in_spec],
            out_specs=pl.BlockSpec((1, 1, 128), lambda b, k: (b, 0, 0)),
            scratch_shapes=[
                pltpu.VMEM((tb, HW), jnp.float32),    # am_s accumulator
                pltpu.VMEM((tb, HW), jnp.float32),    # am_t accumulator
            ],
        ),
        compiler_params=pltpu.CompilerParams(
            # Batch axis carries no cross-step state -> shard across cores (v7x);
            # channel-chunk axis carries the accumulators -> "arbitrary".
            dimension_semantics=("parallel", "arbitrary"),
            vmem_limit_bytes=vmem_limit,
        ),
    )(s2, t2)

    # Final reduction over per-block partials; F.mse_loss 'mean' over N*1*H*W.
    total = jnp.sum(partials[:, 0, 0])
    return total / jnp.float32(N * H * W)


def _at_loss_ref(fm_s, fm_t, p=2.0, eps=1e-6):
    # Matches the PyTorch module: sum over channels (keepdim), Frobenius norm
    # over (H, W), divide by (norm + eps), then mse_loss with 'mean' reduction.
    def amap(fm):
        am = jnp.sum(jnp.power(jnp.abs(fm.astype(jnp.float32)), p), axis=1, keepdims=True)
        norm = jnp.sqrt(jnp.sum(am * am, axis=(2, 3), keepdims=True))
        return am / (norm + eps)

    d = amap(fm_s) - amap(fm_t)
    return jnp.mean(d * d)


if __name__ == "__main__":
    key = jax.random.PRNGKey(0)
    k1, k2 = jax.random.split(key)
    N, C, H, W = 2, 4, 16, 16
    fm_s = jax.random.normal(k1, (N, C, H, W), dtype=jnp.float32)
    fm_t = jax.random.normal(k2, (N, C, H, W), dtype=jnp.float32)

    p = 2.0  # exponent hyperparameter of AT(p)

    loss = at_loss(fm_s, fm_t, p=p)
    loss = jax.block_until_ready(loss)

    ref = _at_loss_ref(fm_s, fm_t, p=p)
    assert jnp.allclose(loss, ref, rtol=1e-5, atol=1e-6), (loss, ref)

    print("KERNEL_OK")
</pallas_src>

<mosaic_0001>
module attributes {stable_mosaic.version = 11 : i64} {
  func.func @_at_kernel(%arg0: i32, %arg1: i32, %arg2: memref<1x4x256xf32, #tpu.memory_space<vmem>>, %arg3: memref<1x4x256xf32, #tpu.memory_space<vmem>>, %arg4: memref<1x1x128xf32, #tpu.memory_space<vmem>>, %arg5: memref<1x256xf32, #tpu.memory_space<vmem>>, %arg6: memref<1x256xf32, #tpu.memory_space<vmem>>) attributes {dimension_semantics = [#tpu.dimension_semantics<parallel>, #tpu.dimension_semantics<arbitrary>], iteration_bounds = array<i64: 2, 1>, scalar_prefetch = 0 : i64, scratch_operands = 2 : i64, tpu.core_type = #tpu.core_type<tc>, window_params = [{transform_indices = @transform_0, window_bounds = array<i64: 1, 4, 256>}, {transform_indices = @transform_1, window_bounds = array<i64: 1, 4, 256>}, {transform_indices = @transform_2, window_bounds = array<i64: 1, 1, 128>}]} {
    %c0_i32 = arith.constant 0 : i32
    %0 = arith.cmpi eq, %arg1, %c0_i32 : i32
    %1 = arith.extui %0 : i1 to i32
    %c0_i32_0 = arith.constant 0 : i32
    %2 = arith.cmpi ne, %1, %c0_i32_0 : i32
    scf.if %2 {
      %cst_17 = arith.constant 0.000000e+00 : f32
      %18 = vector.broadcast %cst_17 : f32 to vector<1x256xf32>
      %c0_18 = arith.constant 0 : index
      %c0_19 = arith.constant 0 : index
      %19 = vector.load %arg5[%c0_18, %c0_19] : memref<1x256xf32, #tpu.memory_space<vmem>>, vector<1x256xf32>
      tpu.vector_store %arg5[%c0_18, %c0_19], %18 {strides = array<i32>} : memref<1x256xf32, #tpu.memory_space<vmem>>, vector<1x256xf32>,
      %cst_20 = arith.constant 0.000000e+00 : f32
      %20 = vector.broadcast %cst_20 : f32 to vector<1x256xf32>
      %c0_21 = arith.constant 0 : index
      %c0_22 = arith.constant 0 : index
      %21 = vector.load %arg6[%c0_21, %c0_22] : memref<1x256xf32, #tpu.memory_space<vmem>>, vector<1x256xf32>
      tpu.vector_store %arg6[%c0_21, %c0_22], %20 {strides = array<i32>} : memref<1x256xf32, #tpu.memory_space<vmem>>, vector<1x256xf32>,
    } else {
    }
    %c0 = arith.constant 0 : index
    %c0_1 = arith.constant 0 : index
    %c0_2 = arith.constant 0 : index
    %3 = vector.load %arg2[%c0, %c0_1, %c0_2] : memref<1x4x256xf32, #tpu.memory_space<vmem>>, vector<1x4x256xf32>
    %c0_3 = arith.constant 0 : index
    %c0_4 = arith.constant 0 : index
    %c0_5 = arith.constant 0 : index
    %4 = vector.load %arg3[%c0_3, %c0_4, %c0_5] : memref<1x4x256xf32, #tpu.memory_space<vmem>>, vector<1x4x256xf32>
    %c0_6 = arith.constant 0 : index
    %c0_7 = arith.constant 0 : index
    %5 = vector.load %arg5[%c0_6, %c0_7] : memref<1x256xf32, #tpu.memory_space<vmem>>, vector<1x256xf32>
    %6 = arith.mulf %3, %3 : vector<1x4x256xf32>
    %cst = arith.constant dense<0.000000e+00> : vector<1x256xf32>
    %7 = vector.multi_reduction <add>, %6, %cst [1] : vector<1x4x256xf32> to vector<1x256xf32>
    %8 = arith.addf %5, %7 : vector<1x256xf32>
    %c0_8 = arith.constant 0 : index
    %c0_9 = arith.constant 0 : index
    %9 = vector.load %arg5[%c0_8, %c0_9] : memref<1x256xf32, #tpu.memory_space<vmem>>, vector<1x256xf32>
    tpu.vector_store %arg5[%c0_8, %c0_9], %8 {strides = array<i32>} : memref<1x256xf32, #tpu.memory_space<vmem>>, vector<1x256xf32>,
    %c0_10 = arith.constant 0 : index
    %c0_11 = arith.constant 0 : index
    %10 = vector.load %arg6[%c0_10, %c0_11] : memref<1x256xf32, #tpu.memory_space<vmem>>, vector<1x256xf32>
    %11 = arith.mulf %4, %4 : vector<1x4x256xf32>
    %cst_12 = arith.constant dense<0.000000e+00> : vector<1x256xf32>
    %12 = vector.multi_reduction <add>, %11, %cst_12 [1] : vector<1x4x256xf32> to vector<1x256xf32>
    %13 = arith.addf %10, %12 : vector<1x256xf32>
    %c0_13 = arith.constant 0 : index
    %c0_14 = arith.constant 0 : index
    %14 = vector.load %arg6[%c0_13, %c0_14] : memref<1x256xf32, #tpu.memory_space<vmem>>, vector<1x256xf32>
    tpu.vector_store %arg6[%c0_13, %c0_14], %13 {strides = array<i32>} : memref<1x256xf32, #tpu.memory_space<vmem>>, vector<1x256xf32>,
    %c0_i32_15 = arith.constant 0 : i32
    %15 = arith.cmpi eq, %arg1, %c0_i32_15 : i32
    %16 = arith.extui %15 : i1 to i32
    %c0_i32_16 = arith.constant 0 : i32
    %17 = arith.cmpi ne, %16, %c0_i32_16 : i32
    scf.if %17 {
      %c0_17 = arith.constant 0 : index
      %c0_18 = arith.constant 0 : index
      %18 = vector.load %arg5[%c0_17, %c0_18] : memref<1x256xf32, #tpu.memory_space<vmem>>, vector<1x256xf32>
      %c0_19 = arith.constant 0 : index
      %c0_20 = arith.constant 0 : index
      %19 = vector.load %arg6[%c0_19, %c0_20] : memref<1x256xf32, #tpu.memory_space<vmem>>, vector<1x256xf32>
      %20 = arith.mulf %18, %18 : vector<1x256xf32>
      %cst_21 = arith.constant dense<0.000000e+00> : vector<1xf32>
      %21 = vector.multi_reduction <add>, %20, %cst_21 [1] : vector<1x256xf32> to vector<1xf32>
      %22 = vector.shape_cast %21 : vector<1xf32> to vector<1x1xf32>
      %23 = math.sqrt %22 : vector<1x1xf32>
      %24 = arith.mulf %19, %19 : vector<1x256xf32>
      %cst_22 = arith.constant dense<0.000000e+00> : vector<1xf32>
      %25 = vector.multi_reduction <add>, %24, %cst_22 [1] : vector<1x256xf32> to vector<1xf32>
      %26 = vector.shape_cast %25 : vector<1xf32> to vector<1x1xf32>
      %27 = math.sqrt %26 : vector<1x1xf32>
      %cst_23 = arith.constant 9.99999997E-7 : f32
      %28 = vector.broadcast %cst_23 : f32 to vector<1x1xf32>
      %29 = arith.addf %23, %28 : vector<1x1xf32>
      %30 = tpu.reciprocal %29 : vector<1x1xf32> -> vector<1x1xf32>
      %cst_24 = arith.constant 9.99999997E-7 : f32
      %31 = vector.broadcast %cst_24 : f32 to vector<1x1xf32>
      %32 = arith.addf %27, %31 : vector<1x1xf32>
      %33 = tpu.reciprocal %32 : vector<1x1xf32> -> vector<1x1xf32>
      %34 = vector.broadcast %30 : vector<1x1xf32> to vector<1x256xf32>
      %35 = arith.mulf %18, %34 : vector<1x256xf32>
      %36 = vector.broadcast %33 : vector<1x1xf32> to vector<1x256xf32>
      %37 = arith.mulf %19, %36 : vector<1x256xf32>
      %38 = arith.subf %35, %37 : vector<1x256xf32>
      %39 = arith.mulf %38, %38 : vector<1x256xf32>
      %40 = vector.shape_cast %39 : vector<1x256xf32> to vector<1x1x256xf32>
      %cst_25 = arith.constant dense<0.000000e+00> : vector<1xf32>
      %41 = vector.multi_reduction <add>, %40, %cst_25 [1, 2] : vector<1x1x256xf32> to vector<1xf32>
      %42 = vector.shape_cast %41 : vector<1xf32> to vector<1x1x1xf32>
      %43 = vector.extract %42[0, 0, 0] : f32 from vector<1x1x1xf32>
      %44 = vector.broadcast %43 : f32 to vector<1x1x128xf32>
      %c0_26 = arith.constant 0 : index
      %c0_27 = arith.constant 0 : index
      %c0_28 = arith.constant 0 : index
      %45 = vector.load %arg4[%c0_26, %c0_27, %c0_28] : memref<1x1x128xf32, #tpu.memory_space<vmem>>, vector<1x1x128xf32>
      tpu.vector_store %arg4[%c0_26, %c0_27, %c0_28], %44 {strides = array<i32>} : memref<1x1x128xf32, #tpu.memory_space<vmem>>, vector<1x1x128xf32>,
    } else {
    }
    return
  }
  func.func @transform_0(%arg0: i32, %arg1: i32) -> (i32, i32, i32) {
    %c0_i32 = arith.constant 0 : i32
    %c0_i32_0 = arith.constant 0 : i32
    return %arg0, %arg1, %c0_i32 : i32, i32, i32
  }
  func.func @transform_1(%arg0: i32, %arg1: i32) -> (i32, i32, i32) {
    %c0_i32 = arith.constant 0 : i32
    %c0_i32_0 = arith.constant 0 : i32
    return %arg0, %arg1, %c0_i32 : i32, i32, i32
  }
  func.func @transform_2(%arg0: i32, %arg1: i32) -> (i32, i32, i32) {
    %c0_i32 = arith.constant 0 : i32
    %c0_i32_0 = arith.constant 0 : i32
    %c0_i32_1 = arith.constant 0 : i32
    return %arg0, %c0_i32, %c0_i32_0 : i32, i32, i32
  }
}

</mosaic_0001>

<bundles_post_ra>
// kernel: tpu_custom_call.1
= control target key start
LH: loop header
LB: loop body
LE: loop exit
PB: predicated region body
PF: predicated region fallthrough
CT: control target
= control target key end

     0   :  { %7 = vsyncpa [#allocation5], 0  ;;  %s1031_s0 = inlined_call_operand.hbm [shape: f32[2,4,256], index: 0, kind: input, shape index: {}]   ;;  %s1032_s1 = inlined_call_operand.hbm [shape: f32[2,4,256], index: 1, kind: input, shape index: {}]   ;;  %s1033_s2 = inlined_call_operand.hbm [shape: f32[2,1,128], index: 2, kind: output, shape index: {}]  }
   0x1   :  { %9 = vsyncpa [#allocation5 + $0x1], 0 }
   0x2   :  { %10 = vsyncpa [#allocation8], 0 }
   0x3   :  { %12 = vsyncpa [#allocation8 + $0x1], 0 }
   0x4   :  { %13 = vsyncpa [#allocation6], 0 }
   0x5   :  { %15 = vsyncpa [#allocation6 + $0x1], 0  ;;  %s792_s9 = smov 0   ;;  %s794_s10 = smov 0  }
   0x6   :  { %s796_s11 = smov 0   ;;  %s798_s12 = smov 0  }
   0x7   :  { %s800_s13 = smov 0   ;;  %s802_s14 = smov 0  }
   0x8 LB: > { %s527_s15 = sadd.s32 4294967295, %s770_s14   ;;  %s528_s16 = sadd.s32 4294967294, %s770_s14   ;;  %s770_s14 = sphi %s802_s14, %s21_s14   ;;  %s766_s13 = sphi %s800_s13, %s1055_s13   ;;  %s762_s12 = sphi %s798_s12, %s1054_s12   ;;  %s758_s11 = sphi %s796_s11, %s1053_s11   ;;  %s754_s10 = sphi %s794_s10, %s1052_s10   ;;  %s750_s9 = sphi %s792_s9, %s1051_s9  }
   0x9   : > { %s33_s17 = sadd.s32 1, %s766_s13  ;;  %s42_s18 = sadd.s32 1, %s758_s11 }
   0xa   : > { %p35_p0 = scmp.ge.s32.totalorder %s33_s17, 2  ;;  %p49_p1 = scmp.ne.s32.totalorder %s758_s11, %s754_s10 }
   0xb   : > { %p50_p2 = scmp.eq.s32.totalorder %s770_s14, 0  ;;  %p55_p3 = scmp.ne.s32.totalorder %s754_s10, %s750_s9 }
   0xc   : > { %s1057_s17 = smov (%p35_p0, %s33_s17), 0  ;;  %p56_p5 = scmp.eq.s32.totalorder %s527_s15, 0 }
   0xd   : > { %p833_p4 = por %p50_p2, %p49_p1  ;;  %s37_s20 = ssub.s32 %s766_s13, %s1057_s17 }
   0xe   : > { %p107_p6 = scmp.eq.s32.totalorder %s527_s15, 1  ;;  %p40_p7 = scmp.eq.s32.totalorder %s37_s20, 0 }
   0xf   : > { %p839_p8 = por %p56_p5, %p55_p3  ;;  %p113_p10 = scmp.eq.s32.totalorder %s528_s16, 1 }
  0x10   : > { %p843_p9 = por %p107_p6, %p49_p1  ;;  %p564_p13 = scmp.lt.s32.totalorder %s770_s14, 2 }
  0x11   : > { %s1037_s21 = scalar_select %p839_p8, 1, 0 }
  0x12   : > { %s1038_s22 = scalar_select %p843_p9, 1, 0 }
  0x13   : > { %s848_s23 = scalar_select %p40_p7, %s758_s11, %s42_s18  }
  0x14   : > { %p850_p11 = por %p113_p10, %p55_p3  ;;  %s857_s25 = sand.u32 1, %s758_s11  }
  0x15   : > { %s531_s26 = sshll.u32 %s857_s25, 3  ;;  %s543_s27 = sshll.u32 %s766_s13, 7 }
  0x16   : > { %s1039_s24 = scalar_select %p850_p11, 1, 0 }
  0x17   : > { %s866_s30 = scalar_lea.hbm %s1031_s0, %s543_s27  ;;  %s137_s3 = scalar_lea.vmem [#allocation4], %s531_s26 }
  0x18   : > { %s147_s4 = sshll.u32 %s137_s3, 4  ;;  %p874_p0 = pnand %p564_p13, %p833_p4  ;;  %s870_s4 = int_to_ptr.vmem [resolvable:$true] %s147_s4 }
  0x19   : > { %s134_s6 = scalar_lea.sflag [#allocation5], %s857_s25  ;;  %s624_s7 = scalar_lea.hbm %s866_s30, 128 }
  0x1a   : > { %p625_p3 = scmp.ne.s32.totalorder %s866_s30, %s624_s7  ;;  %p626_p5 = pneg %p874_p0 }
  0x1b   : > { %s629_s16 = scalar_lea.hbm %s1031_s0, 256  ;;  %p630_p4 = scmp.lt.u32.totalorder %s866_s30, %s1031_s0 }
  0x1c   : > { %p627_p6 = pnand %p626_p5, %p625_p3  ;;  %p631_p10 = scmp.lt.u32.totalorder %s629_s16, %s624_s7 }
  0x1d   : > { %p633_p12 = scmp.lt.u32.totalorder %s624_s7, %s866_s30 }
  0x1e   : > { %p628_p7 = pneg %p627_p6  ;;  %p632_p13 = por %p631_p10, %p630_p4 }
  0x20   : > { %p634_p1 = por %p633_p12, %p632_p13 }
  0x22   : > { %p635_p2 = pnand %p634_p1, %p628_p7 }
  0x24   : > { %638 = shalt.err (!%p635_p2)
}
  0x25   : > { %s639_s20 = scalar_lea.vmem %s870_s4, 128  ;;  %s772_s28 = smov [#allocation4]  }
  0x26   : > { %p640_p3 = scmp.ne.s32.totalorder %s870_s4, %s639_s20  ;;  %s644_s29 = sshll.u32 %s772_s28, 4  ;;  %s645_s29 = int_to_ptr.vmem [resolvable:$false] %s644_s29 }
  0x27   : > { %s646_s3 = scalar_lea.vmem %s645_s29, 256  ;;  %p647_p9 = scmp.lt.s32.totalorder %s870_s4, %s645_s29 }
  0x28   : > { %p642_p6 = pnand %p640_p3, %p626_p5  ;;  %p648_p4 = scmp.lt.s32.totalorder %s646_s3, %s639_s20 }
  0x2a   : > { %p643_p11 = pneg %p642_p6  ;;  %p649_p10 = por %p648_p4, %p647_p9 }
  0x2c   : > { %p650_p12 = pnand %p649_p10, %p643_p11 }
  0x2e   : > { %653 = shalt.err (!%p650_p12)
}
  0x2f   : > { %556 = dma.hbm_to_vmem [thread:$0]  (!%p874_p0), %s866_s30, 128, %s870_s4, %s134_s6  }
  0x30   : > { %p1041_p1 = scmp.lt.s32.totalorder %s770_s14, 3  ;;  %p1042_p2 = scmp.ge.s32.totalorder %s770_s14, 1 }
  0x31   : > { %s919_s16 = scalar_lea.hbm %s1032_s1, %s543_s27  ;;  %s158_s18 = scalar_lea.vmem [#allocation7], %s531_s26 }
  0x32   : > { %p910_p7 = pnand %p1042_p2, %p1041_p1  ;;  %s168_s19 = sshll.u32 %s158_s18, 4  ;;  %s169_s19 = int_to_ptr.vmem [resolvable:$true] %s168_s19 }
  0x33   : > { %s155_s30 = scalar_lea.sflag [#allocation8], %s857_s25  ;;  %s654_s4 = scalar_lea.hbm %s919_s16, 128 }
  0x34   : > { %s1043_s7 = scalar_select %p910_p7, 1, 0 }
  0x35   : > { %p655_p9 = scmp.ne.s32.totalorder %s919_s16, %s654_s4  ;;  %s659_s27 = scalar_lea.hbm %s1032_s1, 256 }
  0x36   : > { %p660_p3 = scmp.lt.u32.totalorder %s919_s16, %s1032_s1  ;;  %p661_p6 = scmp.lt.u32.totalorder %s659_s27, %s654_s4 }
  0x37   : > { %p657_p11 = pnand %p655_p9, %p626_p5  ;;  %p663_p10 = scmp.lt.u32.totalorder %s654_s4, %s919_s16 }
  0x38   : > { %p662_p4 = por %p661_p6, %p660_p3 }
  0x39   : > { %p658_p13 = pneg %p657_p11 }
  0x3a   : > { %p664_p12 = por %p663_p10, %p662_p4 }
  0x3c   : > { %p665_p1 = pnand %p664_p12, %p658_p13 }
  0x3e   : > { %668 = shalt.err (!%p665_p1)
}
  0x3f   : > { %s669_s25 = scalar_lea.vmem %s169_s19, 128  ;;  %s773_s26 = smov [#allocation7]  }
  0x40   : > { %p670_p2 = scmp.ne.s32.totalorder %s169_s19, %s669_s25  ;;  %s674_s3 = sshll.u32 %s773_s26, 4  ;;  %s675_s3 = int_to_ptr.vmem [resolvable:$false] %s674_s3 }
  0x41   : > { %s676_s8 = scalar_lea.vmem %s675_s3, 256  ;;  %p677_p8 = scmp.lt.s32.totalorder %s169_s19, %s675_s3 }
  0x42   : > { %p672_p9 = pnand %p670_p2, %p626_p5  ;;  %p678_p7 = scmp.lt.s32.totalorder %s676_s8, %s669_s25 }
  0x44   : > { %p673_p11 = pneg %p672_p9  ;;  %p679_p3 = por %p678_p7, %p677_p8 }
  0x46   : > { %p680_p6 = pnand %p679_p3, %p673_p11 }
  0x48   : > { %683 = shalt.err (!%p680_p6)
}
  0x49   : > { %559 = dma.hbm_to_vmem [thread:$0]  (!%p874_p0), %s919_s16, 128, %s169_s19, %s155_s30  }
  0x4a   : > { %p1044_p13 = scmp.ne.s32.totalorder %s1043_s7, 0 }
  0x4b   : > { %s946_s15 = sand.u32 (!%p1044_p13), 1, %s754_s10   ;;  %p1045_p5 = scmp.ne.s32.totalorder (!%p1044_p13), %s1037_s21, 0 }
  0x4c   : > { %177 = sbr.rel (%p1044_p13) target bundleno = 533 (0x215), region = 28  ;;  %s538_s18 = sshll.u32 (!%p1044_p13), %s946_s15, 3 }
  0x4d   : > { %s180_s4 = scalar_lea.sflag (!%p1044_p13), [#allocation5], %s946_s15  ;;  %s183_s6 = scalar_lea.vmem (!%p1044_p13), [#allocation4], %s538_s18 }
  0x53   : > { %737 = dma.done.wait (%p1045_p5), %s180_s4, 128  }
  0x54   : > { %739 = vsyncadd (%p1045_p5), %s180_s4, 4294967168  ;;  %s189_s5 = scalar_lea.sflag [#allocation8], %s946_s15  ;;  %s192_s16 = scalar_lea.vmem [#allocation7], %s538_s18 }
  0x55   : > { %741 = dma.done.wait (%p1045_p5), %s189_s5, 128  }
  0x56   : > { %743 = vsyncadd (%p1045_p5), %s189_s5, 4294967168  ;;  %v221_v0 = vlaneseq  ;;  %v774_v2 = vmov 0.0   ;;  %v227_v3 = vld [vmem:[%s183_s6] sm:$0xff]  ;;  %v228_v4 = vld [vmem:[%s192_s16] sm:$0xff]  ;;  %vm234_vm1 = vcmask 1043456   ;;  %vm329_vm2 = vcmask 1040384  }
  0x57   : > { %v230_v5 = vmul.f32 %v227_v3, %v227_v3  ;;  %v274_v6 = vmul.f32 %v228_v4, %v228_v4  ;;  %v775_v19 = vmov 1966171168   ;;  %s216_s21 = scalar_lea.vmem [#allocation9], %s946_s15  ;;  %s540_s19 = sshll.u32 %s762_s12, 4 }
  0x58   : > { %vm959_vm0 = vcmp.lt.s32.totalorder %v221_v0, 256  ;;  %v253_v20 = vunpack.c.l.s4 %v775_v19  ;;  %v256_v30 = vshrl.u32 %v221_v0, 7  ;;  %s424_s7 = sshll.u32 %s216_s21, 4  ;;  %s984_s28 = scalar_lea.hbm %s1033_s2, %s540_s19  ;;  %s979_s7 = int_to_ptr.vmem [resolvable:$true] %s424_s7 }
  0x59   : > { %225 = vst.msk [vmem:[#allocation2] sm:$0x3] %vm959_vm0, %v774_v2  ;;  %226 = vst.msk [vmem:[#allocation3] sm:$0x3] %vm959_vm0, %v774_v2  ;;  %v232_v7 = vcombine.high %v230_v5, %v230_v5  ;;  %v235_v8 = vsel %vm234_vm1, %v230_v5, 0.0  ;;  %v276_v9 = vcombine.high %v274_v6, %v274_v6  ;;  %v278_v10 = vsel %vm234_vm1, %v274_v6, 0.0 }
  0x5a   : > { %v236_v11 = vrot.slane %v235_v8, 4  ;;  %v279_v12 = vrot.slane %v278_v10, 4  ;;  %v254_v29 = vunpack.c.0.s8 %v253_v20  ;;  %v321_v52 = vsub.s32 0, %v256_v30  ;;  %s412_s29 = scalar_lea.sflag [#allocation6], %s946_s15  ;;  %s684_s25 = scalar_lea.vmem %s979_s7, 16 }
  0x5b   : > { %v242_v13 = vsel %vm234_vm1, %v232_v7, 0.0  ;;  %v285_v14 = vsel %vm234_vm1, %v276_v9, 0.0  ;;  %v325_v53 = vsub.s32 1, %v256_v30  ;;  %p685_p8 = scmp.ne.s32.totalorder %s979_s7, %s684_s25  ;;  %p1048_p0 = scmp.ne.s32.totalorder %s1038_s22, 0 }
  0x5c   : > { %v237_v15 = vadd.f32 %v236_v11, %v235_v8  ;;  %v243_v16 = vrot.slane %v242_v13, 4  ;;  %v280_v17 = vadd.f32 %v279_v12, %v278_v10  ;;  %v286_v18 = vrot.slane %v285_v14, 4  ;;  %s776_s12 = smov [#allocation9]  }
  0x5d   : > { %v257_v40 = vsub.s32 %v254_v29, %v256_v30  ;;  %p686_p7 = pnand %p685_p8, %p1048_p0  ;;  %s688_s26 = sshll.u32 %s776_s12, 4  ;;  %s689_s26 = int_to_ptr.vmem [resolvable:$false] %s688_s26 }
  0x5e   : > { %v238_v21 = vrot.slane %v237_v15, 2  ;;  %v244_v22 = vadd.f32 %v243_v16, %v242_v13  ;;  %v281_v23 = vrot.slane %v280_v17, 2  ;;  %v287_v24 = vadd.f32 %v286_v18, %v285_v14  ;;  %s690_s3 = scalar_lea.vmem %s689_s26, 32  ;;  %p691_p10 = scmp.lt.s32.totalorder %s979_s7, %s689_s26 }
  0x5f   : > { %p687_p4 = pneg %p686_p7  ;;  %p692_p12 = scmp.lt.s32.totalorder %s690_s3, %s684_s25 }
  0x60   : > { %v239_v25 = vadd.f32 %v238_v21, %v237_v15  ;;  %v245_v26 = vrot.slane %v244_v22, 2  ;;  %v282_v27 = vadd.f32 %v281_v23, %v280_v17  ;;  %v288_v28 = vrot.slane %v287_v24, 2  ;;  %v229_v46 = vld [vmem:[#allocation2] sm:$0x3]  ;;  %v273_v47 = vld [vmem:[#allocation3] sm:$0x3] }
  0x61   : > { %p693_p1 = por %p692_p12, %p691_p10 }
  0x62   : > { %v240_v31 = vrot.slane %v239_v25, 1  ;;  %v246_v32 = vadd.f32 %v245_v26, %v244_v22  ;;  %v283_v33 = vrot.slane %v282_v27, 1  ;;  %v289_v34 = vadd.f32 %v288_v28, %v287_v24 }
  0x63   : > { %p694_p2 = pnand %p693_p1, %p687_p4 }
  0x64   : > { %v241_v35 = vadd.f32 %v240_v31, %v239_v25  ;;  %v247_v36 = vrot.slane %v246_v32, 1  ;;  %v284_v37 = vadd.f32 %v283_v33, %v282_v27  ;;  %v290_v38 = vrot.slane %v289_v34, 1 }
  0x66   : > { %v248_v39 = vadd.f32 %v247_v36, %v246_v32  ;;  %v291_v41 = vadd.f32 %v290_v38, %v289_v34 }
  0x68   : > { %v251_v42 = vcombine.low %v241_v35, %v248_v39  ;;  %v294_v43 = vcombine.low %v284_v37, %v291_v41 }
  0x6a   : > { %v258_v44 = vrot.slane %v251_v42, %v257_v40  ;;  %v301_v45 = vrot.slane %v294_v43, %v257_v40 }
  0x6c   : > { %v265_v48 = vrot.slane %v258_v44, %v257_v40  ;;  %v308_v49 = vrot.slane %v301_v45, %v257_v40 }
  0x6e   : > { %v267_v50 = vadd.f32 %v265_v48, %v229_v46  ;;  %v310_v51 = vadd.f32 %v308_v49, %v273_v47 }
  0x70   : > { %272 = vst.msk [vmem:[#allocation2] sm:$0x3] %vm959_vm0, %v267_v50  ;;  %311 = vst.msk [vmem:[#allocation3] sm:$0x3] %vm959_vm0, %v310_v51 }
  0x77   : > { %v315_v54 = vld [vmem:[#allocation2] sm:$0x3]  ;;  %v316_v55 = vld [vmem:[#allocation3] sm:$0x3] }
  0x78   : > { %v317_v56 = vmul.f32 %v315_v54, %v315_v54  ;;  %v342_v57 = vmul.f32 %v316_v55, %v316_v55 }
  0x7a   : > { %v322_v58 = vrot.slane %v317_v56, %v321_v52  ;;  %v326_v59 = vrot.slane %v317_v56, %v325_v53  ;;  %v347_v60 = vrot.slane %v342_v57, %v321_v52  ;;  %v351_v61 = vrot.slane %v342_v57, %v325_v53 }
  0x7c   : > { %v330_v62 = vsel %vm329_vm2, %v322_v58, 0.0  ;;  %v331_v63 = vsel %vm329_vm2, %v326_v59, 0.0  ;;  %v354_v0 = vsel %vm329_vm2, %v347_v60, 0.0  ;;  %v355_v1 = vsel %vm329_vm2, %v351_v61, 0.0 }
  0x7d   : > { %v332_v2 = vadd.f32 %v331_v63, %v330_v62  ;;  %v356_v3 = vadd.f32 %v355_v1, %v354_v0 }
  0x7f   : > { %333 = vadd.xlane.f32.xlu0 %v332_v2 }
  0x83   : > { %357 = vadd.xlane.f32.xlu0 %v356_v3 }
 0x10c   : > { %v334_v4 = vpop.xlane.xlu0 %333 }
 0x10d   : > { %616 = vrsqrt.f32 %v334_v4  ;;  %vm337_vm3 = vcmp.eq.f32.partialorder %v334_v4, inf  ;;  %v340_v8 = vand.u32 2147483648, %v334_v4  ;;  %vm339_vm4 = vcmp.eq.f32.partialorder %v334_v4, 0.0 }
 0x110   : > { %v358_v5 = vpop.xlane.xlu0 %357 }
 0x111   : > { %618 = vrsqrt.f32 %v358_v5  ;;  %vm361_vm5 = vcmp.eq.f32.partialorder %v358_v5, inf  ;;  %v364_v14 = vand.u32 2147483648, %v358_v5  ;;  %vm363_vm6 = vcmp.eq.f32.partialorder %v358_v5, 0.0 }
 0x117   : > { %v617_v6 = vpop.eup %616 }
 0x118   : > { %v336_v7 = vmul.f32 %v617_v6, %v334_v4 }
 0x11a   : > { %v338_v9 = vsel %vm337_vm3, %v334_v4, %v336_v7 }
 0x11b   : > { %v619_v10 = vpop.eup %618  ;;  %v341_v11 = vsel %vm339_vm4, %v340_v8, %v338_v9 }
 0x11c   : > { %v366_v12 = vadd.f32 1e-06, %v341_v11  ;;  %v360_v13 = vmul.f32 %v619_v10, %v358_v5 }
 0x11e   : > { %620 = vrcp.f32 %v366_v12  ;;  %v362_v15 = vsel %vm361_vm5, %v358_v5, %v360_v13 }
 0x11f   : > { %v365_v16 = vsel %vm363_vm6, %v364_v14, %v362_v15 }
 0x120   : > { %v368_v17 = vadd.f32 1e-06, %v365_v16 }
 0x122   : > { %622 = vrcp.f32 %v368_v17 }
 0x128   : > { %v621_v18 = vpop.eup %620 }
 0x129   : > { %v374_v19 = vrot.slane %v621_v18, %v321_v52 }
 0x12b   : > { %v376_v22 = vmul.f32 %v374_v19, %v315_v54 }
 0x12c   : > { %v623_v20 = vpop.eup %622 }
 0x12d   : > { %v381_v21 = vrot.slane %v623_v20, %v321_v52 }
 0x12f   : > { %v383_v23 = vmul.f32 %v381_v21, %v316_v55 }
 0x131   : > { %v384_v24 = vsub.f32 %v376_v22, %v383_v23 }
 0x133   : > { %v385_v25 = vmul.f32 %v384_v24, %v384_v24 }
 0x135   : > { %v390_v26 = vrot.slane %v385_v25, %v321_v52  ;;  %v394_v27 = vrot.slane %v385_v25, %v325_v53 }
 0x137   : > { %v397_v28 = vsel %vm329_vm2, %v390_v26, 0.0  ;;  %v398_v29 = vsel %vm329_vm2, %v394_v27, 0.0 }
 0x138   : > { %v399_v30 = vadd.f32 %v398_v29, %v397_v28 }
 0x13a   : > { %400 = vadd.xlane.f32.xlu1 %v399_v30 }
 0x1c7   : > { %v401_v31 = vpop.xlane.xlu1 %400 }
 0x1c8   : > { %v402_v32 = vrot.slane %v401_v31, 4 }
 0x1ca   : > { %v403_v33 = vadd.f32 %v402_v32, %v401_v31 }
 0x1cc   : > { %v404_v34 = vrot.slane %v403_v33, 2 }
 0x1ce   : > { %v405_v35 = vadd.f32 %v404_v34, %v403_v33 }
 0x1d0   : > { %v406_v36 = vrot.slane %v405_v35, 1 }
 0x1d2   : > { %v407_v37 = vadd.f32 %v406_v36, %v405_v35 }
 0x1d4   : > { %545 = vpush %v407_v37 }
 0x205   : > { %s546_s30 = spop %545 }
 0x206   : > { %v409_v38 = vstv %s546_s30 }
 0x207   : > { %410 = vst [vmem:[%s216_s21] sm:$0x1] %v409_v38 }
 0x208   : > { %697 = shalt.err (!%p694_p2)
}
 0x209   : > { %s698_s8 = scalar_lea.hbm %s984_s28, 16  ;;  %s702_s4 = scalar_lea.hbm %s1033_s2, 32 }
 0x20a   : > { %p699_p9 = scmp.ne.s32.totalorder %s984_s28, %s698_s8  ;;  %p703_p6 = scmp.lt.u32.totalorder %s984_s28, %s1033_s2 }
 0x20b   : > { %p704_p13 = scmp.lt.u32.totalorder %s702_s4, %s698_s8  ;;  %p706_p8 = scmp.lt.u32.totalorder %s698_s8, %s984_s28 }
 0x20c   : > { %p700_p11 = pnand %p699_p9, %p1048_p0 }
 0x20d   : > { %p705_p5 = por %p704_p13, %p703_p6 }
 0x20e   : > { %p701_p3 = pneg %p700_p11 }
 0x20f   : > { %p707_p7 = por %p706_p8, %p705_p5 }
 0x211   : > { %p708_p4 = pnand %p707_p7, %p701_p3 }
 0x213   : > { %711 = shalt.err (!%p708_p4)
}
 0x214   : > { %551 = dma.vmem_to_hbm [thread:$0]  (%p1048_p0), %s979_s7, 16, %s984_s28, %s412_s29  }
 0x215 PF: > { %s436_s16 = sand.u32 1, %s750_s9   ;;  %p1049_p10 = scmp.ne.s32.totalorder %s1039_s24, 0 }
 0x216   : > { %p1050_p12 = scmp.ge.s32.totalorder %s770_s14, 2  ;;  %s437_s21 = scalar_lea.sflag [#allocation6], %s436_s16 }
 0x218   : > { %p561_p1 = pnand %p1050_p12, %p1049_p10 }
 0x21a   : > { %745 = dma.done.wait (!%p561_p1), %s437_s21, 16  }
 0x21b   : > { %747 = vsyncadd (!%p561_p1), %s437_s21, 4294967280  ;;  %s21_s14 = sadd.s32 1, %s770_s14   ;;  %s1051_s9 = smov %s754_s10 }
 0x21c   : > { %p18_p2 = scmp.ge.s32.totalorder %s21_s14, 4   ;;  %s1052_s10 = smov %s758_s11 }
 0x21d   : > { %s1053_s11 = smov %s848_s23  ;;  %s1054_s12 = smov %s766_s13 }
 0x21e   : > { %s1055_s13 = smov %s1057_s17  ;;  %20 = sbr.rel (!%p18_p2) target bundleno = 8 (0x8), region = 94 }
 0x225   :  { %441 = vsyncpa [#allocation5], 1 }
 0x226   :  { %443 = vsyncpa [#allocation5 + $0x1], 1 }
 0x227   :  { %444 = vsyncpa [#allocation8], 1 }
 0x228   :  { %446 = vsyncpa [#allocation8 + $0x1], 1 }
 0x229   :  { %447 = vsyncpa [#allocation6], 1 }
 0x22a   :  { %449 = vsyncpa [#allocation6 + $0x1], 1 }

</bundles_post_ra>
